<compile_context>
chip_gen: v7x
topology: tpu7x:2x2x1
jax: 0.10.0
libtpu: 0.0.40
codegen_flags: <defaults>
</compile_context>

<pallas_src>
import functools

import jax
import jax.numpy as jnp
from jax.experimental import pallas as pl
from jax.experimental.pallas import tpu as pltpu

_LANE = 128


def _gated_trimodal_kernel(x_ref, w_ref, y_ref, zsum_ref, *, n_tiled: bool):
    """One (batch, out-feature) tile of the trimodal gated fusion.

    x_ref    : (3, block_b, D)  packed modalities (full K for the matmul)
    w_ref    : (3, D, tn)       packed gate weights (output-feature slice)
    y_ref    : (block_b, tn)    sum_i z_i * tanh(x_i)
    zsum_ref : (block_b, tn)    sum_i z_i
    """
    tn = y_ref.shape[-1]
    if n_tiled:
        # Column offset of this output-feature tile inside the full D axis.
        col0 = pl.multiple_of(pl.program_id(0) * tn, tn)

    acc_y = jnp.zeros(y_ref.shape, jnp.float32)
    acc_z = jnp.zeros(y_ref.shape, jnp.float32)
    for m in range(3):                        # static unroll over the 3 modalities
        x = x_ref[m]                          # (block_b, D), native dtype
        # MXU: native-dtype operands (bf16-friendly), f32 accumulation.
        z = jax.nn.sigmoid(
            jnp.dot(x, w_ref[m], preferred_element_type=jnp.float32))
        # EUP: tanh in the input dtype (bf16 path stays bf16 on v6e/v7x).
        xh = x_ref[m, :, pl.ds(col0, tn)] if n_tiled else x
        h = jnp.tanh(xh)
        acc_y = acc_y + z * h                 # h promotes to f32
        acc_z = acc_z + z
    y_ref[...] = acc_y.astype(y_ref.dtype)
    zsum_ref[...] = acc_z.astype(zsum_ref.dtype)


def _sublane(dtype) -> int:
    # f32 -> 8 rows per vreg tile, bf16/f16 -> 16, int8/fp8 -> 32.
    return 8 * max(1, 4 // jnp.dtype(dtype).itemsize)


def _vmem_budget_bytes() -> int:
    """Physical VMEM of this generation minus headroom (v7x: only 64 MiB/TC)."""
    try:
        cap = int(pltpu.get_tpu_info().vmem_capacity_bytes)
    except Exception:          # info query unavailable -> conservative (v7x) value
        cap = 64 << 20
    return max(16 << 20, cap - (8 << 20))


def gated_bimodal_packed(xs, ws, *, block_b=None):
    """Pallas TPU GatedBimodal forward on packed inputs.

    xs : (3, B, D) stacked modalities x1, x2, x3.
    ws : (3, D, D) stacked gate weights W1, W2, W3.
    Returns (fused, gate_sum), both (B, D) in xs.dtype.  jit-safe.
    """
    three, B, D = xs.shape
    assert three == 3 and ws.shape == (3, D, D), (xs.shape, ws.shape)

    sub = _sublane(xs.dtype)
    x_item = jnp.dtype(xs.dtype).itemsize
    w_item = jnp.dtype(ws.dtype).itemsize

    # --- batch tile: large enough to amortize per-step overhead (kernel is
    # HBM-bandwidth-bound at realistic D), small enough that the grid has
    # >= 4 steps (pipelining on one TC, even split across v7x's two TCs).
    if block_b is None:
        quarter = max(sub, ((B // 4) // sub) * sub)
        block_b = max(sub, min(1024, quarter, B))
    block_b = min(block_b, B)
    if block_b != B and block_b % sub:
        block_b = max(sub, (block_b // sub) * sub)

    # --- output-feature (N) tile: shrink until the per-step working set fits
    # the device VMEM budget (no reduction split -> no accumulator scratch).
    budget = _vmem_budget_bytes()

    def est_vmem(bb, tn):
        x_blk = 3 * bb * D * x_item * 2        # double-buffered input stream
        w_blk = 3 * D * tn * w_item * 2        # weight block (resident over batch)
        o_blk = 2 * bb * tn * x_item * 2       # two double-buffered outputs
        tmp = 8 * bb * max(tn, _LANE) * 4      # f32 intermediates / headroom
        return x_blk + w_blk + o_blk + tmp

    tn = D
    while est_vmem(block_b, tn) > budget and tn % (2 * _LANE) == 0:
        tn //= 2                               # stays a multiple of 128, divides D
    while est_vmem(block_b, tn) > budget and block_b % (2 * sub) == 0:
        block_b //= 2

    n_tiles = D // tn if tn != D else 1
    b_tiles = pl.cdiv(B, block_b)
    grid = (n_tiles, b_tiles)                  # W block constant over inner batch axis

    vmem_limit = int(min(max(est_vmem(block_b, tn), 32 << 20), budget))

    kernel = functools.partial(_gated_trimodal_kernel, n_tiled=n_tiles > 1)

    out_shapes = (jax.ShapeDtypeStruct((B, D), xs.dtype),
                  jax.ShapeDtypeStruct((B, D), xs.dtype))

    return pl.pallas_call(
        kernel,
        out_shape=out_shapes,
        grid_spec=pltpu.PrefetchScalarGridSpec(
            num_scalar_prefetch=0,
            grid=grid,
            in_specs=[
                pl.BlockSpec((3, block_b, D), lambda j, i: (0, i, 0)),
                pl.BlockSpec((3, D, tn), lambda j, i: (0, 0, j)),
            ],
            out_specs=[
                pl.BlockSpec((block_b, tn), lambda j, i: (i, j)),
                pl.BlockSpec((block_b, tn), lambda j, i: (i, j)),
            ],
        ),
        compiler_params=pltpu.CompilerParams(
            dimension_semantics=("parallel", "parallel"),
            vmem_limit_bytes=vmem_limit),
    )(xs, ws)


def gated_bimodal(x1, x2, x3, w1, w2, w3, *, block_b=None):
    """Convenience wrapper matching the PyTorch forward signature.

    Prefer gated_bimodal_packed with pre-stacked (3,B,D)/(3,D,D) inputs so the
    per-call stack copies (an extra HBM pass) are avoided.
    """
    return gated_bimodal_packed(jnp.stack([x1, x2, x3]),
                                jnp.stack([w1, w2, w3]),
                                block_b=block_b)


def _kaiming_normal_fan_out(key, dim, dtype=jnp.float32):
    # PyTorch kaiming_normal(mode='fan_out'): std = sqrt(2 / fan_out) = sqrt(2/dim).
    std = (2.0 / dim) ** 0.5
    return (std * jax.random.normal(key, (3, dim, dim), jnp.float32)).astype(dtype)


def _reference(xs, ws):
    xs = xs.astype(jnp.float32)
    ws = ws.astype(jnp.float32)
    h = jnp.tanh(xs)
    z = jax.nn.sigmoid(jnp.einsum("mbd,mde->mbe", xs, ws))
    return (z * h).sum(0), z.sum(0)


if __name__ == "__main__":
    B, D = 256, 128   # small: dim=128, default block_b gives a 4-step batch grid

    key = jax.random.PRNGKey(0)
    kx, kw = jax.random.split(key)
    xs = jax.random.normal(kx, (3, B, D), dtype=jnp.float32)
    ws = _kaiming_normal_fan_out(kw, D)

    # --- f32 path (matches the PyTorch reference numerics) -------------------
    fused, gate_sum = jax.jit(gated_bimodal_packed)(xs, ws)
    jax.block_until_ready((fused, gate_sum))
    ref_fused, ref_gate = _reference(xs, ws)
    assert fused.shape == (B, D) and gate_sum.shape == (B, D)
    assert jnp.allclose(fused, ref_fused, atol=1e-5, rtol=1e-5)
    assert jnp.allclose(gate_sum, ref_gate, atol=1e-5, rtol=1e-5)

    # --- bf16 path (native-dtype MXU operands + bf16 tanh, f32 accumulation) -
    xs_b, ws_b = xs.astype(jnp.bfloat16), ws.astype(jnp.bfloat16)
    fused_b, gate_b = jax.jit(gated_bimodal_packed)(xs_b, ws_b)
    jax.block_until_ready((fused_b, gate_b))
    ref_fused_b, ref_gate_b = _reference(xs_b, ws_b)
    assert jnp.allclose(fused_b.astype(jnp.float32), ref_fused_b, atol=5e-2, rtol=5e-2)
    assert jnp.allclose(gate_b.astype(jnp.float32), ref_gate_b, atol=5e-2, rtol=5e-2)

    # --- module-signature wrapper (unpacked args) also works ------------------
    f2, g2 = gated_bimodal(xs[0], xs[1], xs[2], ws[0], ws[1], ws[2])
    jax.block_until_ready((f2, g2))
    assert jnp.allclose(f2, ref_fused, atol=1e-5, rtol=1e-5)
    assert jnp.allclose(g2, ref_gate, atol=1e-5, rtol=1e-5)

    print("KERNEL_OK")
</pallas_src>

<mosaic_0001>
module attributes {stable_mosaic.version = 11 : i64} {
  func.func @_gated_trimodal_kernel(%arg0: i32, %arg1: i32, %arg2: memref<3x64x128xf32, #tpu.memory_space<vmem>>, %arg3: memref<3x128x128xf32, #tpu.memory_space<vmem>>, %arg4: memref<64x128xf32, #tpu.memory_space<vmem>>, %arg5: memref<64x128xf32, #tpu.memory_space<vmem>>) attributes {dimension_semantics = [#tpu.dimension_semantics<parallel>, #tpu.dimension_semantics<parallel>], iteration_bounds = array<i64: 1, 4>, scalar_prefetch = 0 : i64, scratch_operands = 0 : i64, tpu.core_type = #tpu.core_type<tc>, window_params = [{transform_indices = @transform_0, window_bounds = array<i64: 3, 64, 128>}, {transform_indices = @transform_1, window_bounds = array<i64: 3, 128, 128>}, {transform_indices = @transform_2, window_bounds = array<i64: 64, 128>}, {transform_indices = @transform_3, window_bounds = array<i64: 64, 128>}]} {
    %cst = arith.constant 0.000000e+00 : f32
    %0 = vector.broadcast %cst : f32 to vector<64x128xf32>
    %cst_0 = arith.constant 0.000000e+00 : f32
    %1 = vector.broadcast %cst_0 : f32 to vector<64x128xf32>
    %c0 = arith.constant 0 : index
    %c0_1 = arith.constant 0 : index
    %c0_2 = arith.constant 0 : index
    %2 = vector.load %arg2[%c0, %c0_1, %c0_2] : memref<3x64x128xf32, #tpu.memory_space<vmem>>, vector<1x64x128xf32>
    %3 = vector.shape_cast %2 : vector<1x64x128xf32> to vector<64x128xf32>
    %c0_3 = arith.constant 0 : index
    %c0_4 = arith.constant 0 : index
    %c0_5 = arith.constant 0 : index
    %4 = vector.load %arg3[%c0_3, %c0_4, %c0_5] : memref<3x128x128xf32, #tpu.memory_space<vmem>>, vector<1x128x128xf32>
    %5 = vector.shape_cast %4 : vector<1x128x128xf32> to vector<128x128xf32>
    %cst_6 = arith.constant dense<0.000000e+00> : vector<64x128xf32>
    %6 = tpu.matmul %3, %5, %cst_6 {dimension_numbers = #tpu.dot_dimension_numbers<[1], [0], [0], [1], [0, 0, 1, 1], [], []>} : vector<64x128xf32>, vector<128x128xf32>, vector<64x128xf32> -> vector<64x128xf32>
    %7 = arith.negf %6 : vector<64x128xf32>
    %8 = math.exp %7 : vector<64x128xf32>
    %cst_7 = arith.constant 1.000000e+00 : f32
    %9 = vector.broadcast %cst_7 : f32 to vector<64x128xf32>
    %10 = arith.addf %9, %8 : vector<64x128xf32>
    %11 = arith.divf %9, %10 : vector<64x128xf32>
    %12 = math.tanh %3 : vector<64x128xf32>
    %13 = arith.mulf %11, %12 : vector<64x128xf32>
    %14 = arith.addf %0, %13 : vector<64x128xf32>
    %15 = arith.addf %1, %11 : vector<64x128xf32>
    %c1 = arith.constant 1 : index
    %c0_8 = arith.constant 0 : index
    %c0_9 = arith.constant 0 : index
    %16 = vector.load %arg2[%c1, %c0_8, %c0_9] : memref<3x64x128xf32, #tpu.memory_space<vmem>>, vector<1x64x128xf32>
    %17 = vector.shape_cast %16 : vector<1x64x128xf32> to vector<64x128xf32>
    %c1_10 = arith.constant 1 : index
    %c0_11 = arith.constant 0 : index
    %c0_12 = arith.constant 0 : index
    %18 = vector.load %arg3[%c1_10, %c0_11, %c0_12] : memref<3x128x128xf32, #tpu.memory_space<vmem>>, vector<1x128x128xf32>
    %19 = vector.shape_cast %18 : vector<1x128x128xf32> to vector<128x128xf32>
    %cst_13 = arith.constant dense<0.000000e+00> : vector<64x128xf32>
    %20 = tpu.matmul %17, %19, %cst_13 {dimension_numbers = #tpu.dot_dimension_numbers<[1], [0], [0], [1], [0, 0, 1, 1], [], []>} : vector<64x128xf32>, vector<128x128xf32>, vector<64x128xf32> -> vector<64x128xf32>
    %21 = arith.negf %20 : vector<64x128xf32>
    %22 = math.exp %21 : vector<64x128xf32>
    %cst_14 = arith.constant 1.000000e+00 : f32
    %23 = vector.broadcast %cst_14 : f32 to vector<64x128xf32>
    %24 = arith.addf %23, %22 : vector<64x128xf32>
    %25 = arith.divf %23, %24 : vector<64x128xf32>
    %26 = math.tanh %17 : vector<64x128xf32>
    %27 = arith.mulf %25, %26 : vector<64x128xf32>
    %28 = arith.addf %14, %27 : vector<64x128xf32>
    %29 = arith.addf %15, %25 : vector<64x128xf32>
    %c2 = arith.constant 2 : index
    %c0_15 = arith.constant 0 : index
    %c0_16 = arith.constant 0 : index
    %30 = vector.load %arg2[%c2, %c0_15, %c0_16] : memref<3x64x128xf32, #tpu.memory_space<vmem>>, vector<1x64x128xf32>
    %31 = vector.shape_cast %30 : vector<1x64x128xf32> to vector<64x128xf32>
    %c2_17 = arith.constant 2 : index
    %c0_18 = arith.constant 0 : index
    %c0_19 = arith.constant 0 : index
    %32 = vector.load %arg3[%c2_17, %c0_18, %c0_19] : memref<3x128x128xf32, #tpu.memory_space<vmem>>, vector<1x128x128xf32>
    %33 = vector.shape_cast %32 : vector<1x128x128xf32> to vector<128x128xf32>
    %cst_20 = arith.constant dense<0.000000e+00> : vector<64x128xf32>
    %34 = tpu.matmul %31, %33, %cst_20 {dimension_numbers = #tpu.dot_dimension_numbers<[1], [0], [0], [1], [0, 0, 1, 1], [], []>} : vector<64x128xf32>, vector<128x128xf32>, vector<64x128xf32> -> vector<64x128xf32>
    %35 = arith.negf %34 : vector<64x128xf32>
    %36 = math.exp %35 : vector<64x128xf32>
    %cst_21 = arith.constant 1.000000e+00 : f32
    %37 = vector.broadcast %cst_21 : f32 to vector<64x128xf32>
    %38 = arith.addf %37, %36 : vector<64x128xf32>
    %39 = arith.divf %37, %38 : vector<64x128xf32>
    %40 = math.tanh %31 : vector<64x128xf32>
    %41 = arith.mulf %39, %40 : vector<64x128xf32>
    %42 = arith.addf %28, %41 : vector<64x128xf32>
    %43 = arith.addf %29, %39 : vector<64x128xf32>
    %c0_22 = arith.constant 0 : index
    %c0_23 = arith.constant 0 : index
    %44 = vector.load %arg4[%c0_22, %c0_23] : memref<64x128xf32, #tpu.memory_space<vmem>>, vector<64x128xf32>
    tpu.vector_store %arg4[%c0_22, %c0_23], %42 {strides = array<i32>} : memref<64x128xf32, #tpu.memory_space<vmem>>, vector<64x128xf32>,
    %c0_24 = arith.constant 0 : index
    %c0_25 = arith.constant 0 : index
    %45 = vector.load %arg5[%c0_24, %c0_25] : memref<64x128xf32, #tpu.memory_space<vmem>>, vector<64x128xf32>
    tpu.vector_store %arg5[%c0_24, %c0_25], %43 {strides = array<i32>} : memref<64x128xf32, #tpu.memory_space<vmem>>, vector<64x128xf32>,
    return
  }
  func.func @transform_0(%arg0: i32, %arg1: i32) -> (i32, i32, i32) {
    %c0_i32 = arith.constant 0 : i32
    %c0_i32_0 = arith.constant 0 : i32
    %c0_i32_1 = arith.constant 0 : i32
    return %c0_i32, %arg1, %c0_i32_0 : i32, i32, i32
  }
  func.func @transform_1(%arg0: i32, %arg1: i32) -> (i32, i32, i32) {
    %c0_i32 = arith.constant 0 : i32
    %c0_i32_0 = arith.constant 0 : i32
    %c0_i32_1 = arith.constant 0 : i32
    return %c0_i32, %c0_i32_0, %arg0 : i32, i32, i32
  }
  func.func @transform_2(%arg0: i32, %arg1: i32) -> (i32, i32) {
    %c0_i32 = arith.constant 0 : i32
    return %arg1, %arg0 : i32, i32
  }
  func.func @transform_3(%arg0: i32, %arg1: i32) -> (i32, i32) {
    %c0_i32 = arith.constant 0 : i32
    return %arg1, %arg0 : i32, i32
  }
}

</mosaic_0001>

<bundles_post_ra>
// kernel: gated_bimodal_packed.1
= control target key start
LH: loop header
LB: loop body
LE: loop exit
PB: predicated region body
PF: predicated region fallthrough
CT: control target
= control target key end

     0   :  { %s2335_s0 = inlined_call_operand.hbm [shape: f32[3,256,128], index: 0, kind: input, shape index: {}]   ;;  %s2336_s1 = inlined_call_operand.hbm [shape: f32[3,128,128], index: 1, kind: input, shape index: {}]   ;;  %s2337_s2 = inlined_call_operand.hbm [shape: f32[256,128], index: 2, kind: output, shape index: {0}]   ;;  %s2338_s3 = inlined_call_operand.hbm [shape: f32[256,128], index: 3, kind: output, shape index: {1}]  }
   0x1   :  { %2345 = sst [smem:[#allocation17_spill]] %s2336_s1 }
   0x2   :  { %9 = vsyncpa [#allocation3], 0 }
   0x3   :  { %11 = vsyncpa [#allocation3 + $0x1], 0 }
   0x4   :  { %12 = vsyncpa [#allocation6], 0 }
   0x5   :  { %13 = vsyncpa [#allocation4], 0 }
   0x6   :  { %15 = vsyncpa [#allocation4 + $0x1], 0 }
   0x7   :  { %16 = vsyncpa [#allocation9], 0 }
   0x8   :  { %18 = vsyncpa [#allocation9 + $0x1], 0  ;;  %s1874_s12 = smov 0   ;;  %s1876_s13 = smov 0  }
   0x9   :  { %s1878_s14 = smov 0   ;;  %s1880_s15 = smov 0  }
   0xa   :  { %s1882_s16 = smov 0   ;;  %s1884_s17 = smov 0  }
   0xb LB: > { %s1079_s18 = sadd.s32 4294967295, %s1840_s17   ;;  %s1080_s19 = sadd.s32 4294967294, %s1840_s17   ;;  %s1840_s17 = sphi %s1884_s17, %s24_s17   ;;  %s1836_s16 = sphi %s1882_s16, %s2364_s16   ;;  %s1832_s15 = sphi %s1880_s15, %s2363_s15   ;;  %s1828_s14 = sphi %s1878_s14, %s2362_s14   ;;  %s1824_s13 = sphi %s1876_s13, %s2361_s13   ;;  %s1820_s12 = sphi %s1874_s12, %s2360_s12  }
   0xc   : > { %s33_s20 = sadd.s32 1, %s1836_s16  ;;  %s43_s21 = sadd.s32 1, %s1828_s14 }
   0xd   : > { %p34_p0 = scmp.ge.s32.totalorder %s33_s20, 4  ;;  %p50_p1 = scmp.ne.s32.totalorder %s1828_s14, %s1824_s13 }
   0xe   : > { %p51_p2 = scmp.eq.s32.totalorder %s1840_s17, 0  ;;  %p56_p3 = scmp.ne.s32.totalorder %s1824_s13, %s1820_s12 }
   0xf   : > { %s2366_s20 = smov (%p34_p0, %s33_s20), 0  ;;  %p1919_p5 = scmp.eq.s32.totalorder %s1079_s18, 0 }
  0x10   : > { %p1915_p4 = por %p51_p2, %p50_p1  ;;  %s40_s24 = ssub.s32 %s1836_s16, %s2366_s20 }
  0x11   : > { %s2347_s23 = scalar_select %p1919_p5, 1, 0 }
  0x12   : > { %s2346_s22 = scalar_select %p1915_p4, 1, 0 }
  0x13   : > { %p108_p6 = scmp.eq.s32.totalorder %s1079_s18, 3  ;;  %p41_p7 = scmp.eq.s32.totalorder %s40_s24, 0 }
  0x14   : > { %p1927_p8 = por %p1919_p5, %p56_p3  ;;  %p114_p10 = scmp.eq.s32.totalorder %s1080_s19, 3 }
  0x15   : > { %p1931_p9 = por %p108_p6, %p50_p1  ;;  %p1081_p12 = scmp.ge.s32.totalorder %s1840_s17, 1 }
  0x16   : > { %s2348_s25 = scalar_select %p1927_p8, 1, 0 }
  0x17   : > { %s2349_s26 = scalar_select %p1931_p9, 1, 0 }
  0x18   : > { %s1936_s27 = scalar_select %p41_p7, %s1828_s14, %s43_s21  }
  0x19   : > { %p1938_p11 = por %p114_p10, %p56_p3  ;;  %p149_p13 = scmp.lt.s32.totalorder %s1840_s17, 5 }
  0x1a   : > { %s1842_s30 = smov [#allocation5]   ;;  %s2353_s1 = sld [smem:[#allocation17_spill]] }
  0x1b   : > { %s2350_s28 = scalar_select %p1938_p11, 1, 0 }
  0x1c   : > { %p1944_p0 = pnand %p1081_p12, %p149_p13  ;;  %s163_s4 = sshll.u32 %s1842_s30, 4  ;;  %s164_s4 = int_to_ptr.vmem [resolvable:$true] %s163_s4 }
  0x1e   : > { %s2351_s29 = scalar_select %p1944_p0, 1, 0 }
  0x1f   : > { %p1478_p1 = pneg %p1944_p0 }
  0x20   : > { %s1694_s8 = scalar_lea.hbm %s2353_s1, 6144 }
  0x21   : > { %p1952_p2 = pnand %p1478_p1, %p1919_p5  ;;  %p1695_p3 = scmp.ne.s32.totalorder %s2353_s1, %s1694_s8 }
  0x22   : > { %p1701_p12 = scmp.lt.u32.totalorder %s1694_s8, %s2353_s1 }
  0x23   : > { %p1696_p6 = pneg %p1952_p2 }
  0x25   : > { %p1697_p7 = pnand %p1696_p6, %p1695_p3 }
  0x27   : > { %p1698_p10 = pneg %p1697_p7 }
  0x29   : > { %p1703_p13 = pnand %p1701_p12, %p1698_p10 }
  0x2b   : > { %1706 = shalt.err (!%p1703_p13)
}
  0x2c   : > { %s1707_s19 = scalar_lea.vmem %s164_s4, 6144  ;;  %p1715_p5 = scmp.lt.s32.totalorder %s164_s4, %s164_s4 }
  0x2d   : > { %p1708_p1 = scmp.ne.s32.totalorder %s164_s4, %s1707_s19  ;;  %p1716_p8 = scmp.lt.s32.totalorder %s1707_s19, %s1707_s19 }
  0x2f   : > { %p1710_p11 = pnand %p1708_p1, %p1696_p6  ;;  %p1717_p0 = por %p1716_p8, %p1715_p5 }
  0x31   : > { %p1711_p9 = pneg %p1710_p11 }
  0x33   : > { %p1718_p4 = pnand %p1717_p0, %p1711_p9 }
  0x35   : > { %1721 = shalt.err (!%p1718_p4)
}
  0x36   : > { %s1843_s21 = smov 128   ;;  %s1844_s24 = smov 8  }
  0x37   : > { %1481 = dma.hbm_to_vmem [thread:$0]  (!%p1952_p2), %s2353_s1, 6144, %s164_s4, [#allocation6], %s1843_s21, %s1843_s21, %s1844_s24  }
  0x38   : > { %p1083_p3 = scmp.ge.s32.totalorder %s1840_s17, 4 }
  0x3a   : > { %173 = sbr.rel (%p1083_p3) target bundleno = 81 (0x51), region = 20 }
  0x41   : > { %s177_s7 = sand.u32 1, %s1828_s14   ;;  %s1140_s9 = sshll.u32 %s1836_s16, 10 }
  0x42   : > { %s1459_s8 = smul.u32 192, %s177_s7  ;;  %s1845_s5 = smov 4096  }
  0x43   : > { %p2354_p4 = scmp.ne.s32.totalorder %s2346_s22, 0  ;;  %s1846_s19 = smov 1024  }
  0x44   : > { %s181_s11 = scalar_lea.vmem [#allocation2], %s1459_s8  ;;  %s1847_s21 = smov 8  }
  0x45   : > { %1464 = sst [smem:[#allocation11]] (%p2354_p4), %s1845_s5  ;;  %s200_s18 = sshll.u32 %s181_s11, 4  ;;  %s201_s18 = int_to_ptr.vmem [resolvable:$true] %s200_s18 }
  0x46   : > { %s1463_s4 = scalar_select %p2354_p4, [#allocation0], [#allocation12] }
  0x47   : > { %1465 = sst [smem:[#allocation11 + $0x1]] (%p2354_p4), %s1846_s19  ;;  %s187_s6 = scalar_lea.hbm %s2335_s0, %s1140_s9 }
  0x48   : > { %s192_s10 = sld [smem:[%s1463_s4]]   ;;  %s1848_s1 = smov 128  }
  0x49   : > { %1466 = sst [smem:[#allocation11 + $0x2]] (%p2354_p4), %s1847_s21  ;;  %s178_s4 = scalar_lea.sflag [#allocation3], %s177_s7 }
  0x4a   : > { %1467 = sst [smem:[#allocation11 + $0x3]] (%p2354_p4), %s1848_s1  ;;  %s1849_s11 = smov [#allocation10]  }
  0x4b   : > { %1468 = sst [smem:[#allocation11 + $0x4]] (%p2354_p4), %s1848_s1 }
  0x4c   : > { %1469 = sst [smem:[#allocation11 + $0x5]] (%p2354_p4), %s1847_s21 }
  0x4e   : > { %s1086_s8 = sshll.u32 %s192_s10, 26 }
  0x4f   : > { %s1087_s5 = sadd.s32 134217728, %s1086_s8 }
  0x50   : > { %1470 = dma.general (%p2354_p4), %s187_s6, 3072, %s201_s18, %s178_s4, %s1849_s11, [#allocation11], %s1087_s5, 0  }
  0x51 PF: > { %p2355_p5 = scmp.ne.s32.totalorder %s2351_s29, 0 }
  0x52   : > { %s1997_s9 = sand.u32 (!%p2355_p5), 1, %s1824_s13   ;;  %p2356_p8 = scmp.ne.s32.totalorder (!%p2355_p5), %s2348_s25, 0 }
  0x53   : > { %225 = sbr.rel (%p2355_p5) target bundleno = 452 (0x1c4), region = 28  ;;  %s228_s1 = scalar_lea.sflag (!%p2355_p5), [#allocation3], %s1997_s9 }
  0x54   : > { %s1460_s19 = smul.u32 (!%p2355_p5), 192, %s1997_s9 }
  0x56   : > { %s2001_s24 = scalar_lea.vmem (!%p2355_p5), [#allocation2], %s1460_s19 }
  0x5a   : > { %1803 = dma.done.wait (%p2356_p8), %s228_s1, 3072  }
  0x5b   : > { %1805 = vsyncadd (%p2356_p8), %s228_s1, 4294964224  ;;  %p2357_p9 = scmp.ne.s32.totalorder %s2347_s23, 0 }
  0x5d   : > { %1807 = dma.done.wait (%p2357_p9), [#allocation6], 6144  }
  0x5e   : > { %1809 = vsyncadd (%p2357_p9), [#allocation6], 4294961152  ;;  %v274_v0 = vld [vmem:[#allocation5] sm:$0xff]  ;;  %v275_v1 = vld [vmem:[#allocation5 + $0x8] sm:$0xff]  ;;  %s1090_s22 = sshll.u32 %s1997_s9, 6  ;;  %s1141_s29 = sshll.u32 %s1832_s15, 10 }
  0x5f   : > { %v485_v2 = vld [vmem:[#allocation5 + $0x80] sm:$0xff]  ;;  %v1347_v3 = vpack.c.bf16 %v275_v1, %v274_v0  ;;  %v486_v4 = vld [vmem:[#allocation5 + $0x88] sm:$0xff]  ;;  %v276_v5 = vld [vmem:[#allocation5 + $0x10] sm:$0xff]  ;;  %s2211_s23 = scalar_lea.vmem [#allocation8], %s1090_s22  ;;  %s2220_s25 = scalar_lea.vmem [#allocation7], %s1090_s22 }
  0x60   : > { %v277_v6 = vld [vmem:[#allocation5 + $0x18] sm:$0xff]  ;;  %v1379_v7 = vpack.c.bf16 %v486_v4, %v485_v2  ;;  %v487_v9 = vld [vmem:[#allocation5 + $0x90] sm:$0xff]  ;;  %v278_v11 = vld [vmem:[#allocation5 + $0x20] sm:$0xff]  ;;  %s950_s7 = sshll.u32 %s2211_s23, 4  ;;  %s933_s10 = sshll.u32 %s2220_s25, 4  ;;  %s2245_s7 = int_to_ptr.vmem [resolvable:$true] %s950_s7  ;;  %s2255_s10 = int_to_ptr.vmem [resolvable:$true] %s933_s10 }
  0x61   : > { %v1351_v8 = vpack.c.bf16 %v277_v6, %v276_v5  ;;  %v488_v10 = vld [vmem:[#allocation5 + $0x98] sm:$0xff]  ;;  %1348 = vmatprep.subr.bf16.mxu0 %v1347_v3  ;;  %v279_v13 = vld [vmem:[#allocation5 + $0x28] sm:$0xff]  ;;  %v489_v14 = vld [vmem:[#allocation5 + $0xa0] sm:$0xff]  ;;  %s2243_s30 = scalar_lea.hbm %s2338_s3, %s1141_s29  ;;  %s2253_s8 = scalar_lea.hbm %s2337_s2, %s1141_s29 }
  0x62   : > { %v1383_v12 = vpack.c.bf16 %v488_v10, %v487_v9  ;;  %v490_v15 = vld [vmem:[#allocation5 + $0xa8] sm:$0xff]  ;;  %1380 = vmatprep.subr.bf16.mxu1 %v1379_v7  ;;  %1350 = vmatpush3.bf16.msra.mxu0 %v1347_v3  ;;  %v1355_v16 = vpack.c.bf16 %v279_v13, %v278_v11  ;;  %v280_v18 = vld [vmem:[#allocation5 + $0x30] sm:$0xff]  ;;  %v281_v19 = vld [vmem:[#allocation5 + $0x38] sm:$0xff]  ;;  %s919_s5 = scalar_lea.sflag [#allocation9], %s1997_s9  ;;  %s1722_s4 = scalar_lea.vmem %s2245_s7, 1024 }
  0x63   : > { %1382 = vmatpush3.bf16.msra.mxu1 %v1379_v7  ;;  %1352 = vmatprep.subr.bf16.mxu0 %v1351_v8  ;;  %v1387_v17 = vpack.c.bf16 %v490_v15, %v489_v14  ;;  %v491_v20 = vld [vmem:[#allocation5 + $0xb0] sm:$0xff]  ;;  %v492_v21 = vld [vmem:[#allocation5 + $0xb8] sm:$0xff]  ;;  %v1359_v22 = vpack.c.bf16 %v281_v19, %v280_v18  ;;  %v282_v24 = vld [vmem:[#allocation5 + $0x40] sm:$0xff]  ;;  %p1723_p11 = scmp.ne.s32.totalorder %s2245_s7, %s1722_s4  ;;  %p2358_p0 = scmp.ne.s32.totalorder %s2349_s26, 0 }
  0x64   : > { %1384 = vmatprep.subr.bf16.mxu1 %v1383_v12  ;;  %v1391_v23 = vpack.c.bf16 %v492_v21, %v491_v20  ;;  %v283_v25 = vld [vmem:[#allocation5 + $0x48] sm:$0xff]  ;;  %v2012_v26 = vld [vmem:[%s2001_s24] sm:$0xff]  ;;  %v284_v32 = vld [vmem:[#allocation5 + $0x50] sm:$0xff]  ;;  %s1850_s11 = smov [#allocation8]  }
  0x65   : > { %v493_v27 = vld [vmem:[#allocation5 + $0xc0] sm:$0xff]  ;;  %v494_v28 = vld [vmem:[#allocation5 + $0xc8] sm:$0xff]  ;;  %1247 = vmatprep.mubr.f32.mxu0 %v2012_v26  ;;  %v1363_v30 = vpack.c.bf16 %v283_v25, %v282_v24  ;;  %v285_v33 = vld [vmem:[#allocation5 + $0x58] sm:$0xff]  ;;  %1550 = vtanh.f32 %v2012_v26  ;;  %p1724_p2 = pnand %p1723_p11, %p2358_p0  ;;  %s1726_s19 = sshll.u32 %s1850_s11, 4  ;;  %s1727_s19 = int_to_ptr.vmem [resolvable:$false] %s1726_s19 }
  0x66   : > { %1354 = vmatpush3.bf16.msra.mxu0 %v1351_v8  ;;  %v2016_v29 = vld [vmem:[%s2001_s24 + $0x40] sm:$0xff]  ;;  %v1395_v31 = vpack.c.bf16 %v494_v28, %v493_v27  ;;  %v495_v34 = vld [vmem:[#allocation5 + $0xd0] sm:$0xff]  ;;  %v496_v35 = vld [vmem:[#allocation5 + $0xd8] sm:$0xff]  ;;  %v1367_v36 = vpack.c.bf16 %v285_v33, %v284_v32  ;;  %s1728_s1 = scalar_lea.vmem %s1727_s19, 2048  ;;  %p1729_p7 = scmp.lt.s32.totalorder %s2245_s7, %s1727_s19 }
  0x67   : > { %1386 = vmatpush3.bf16.msra.mxu1 %v1383_v12  ;;  %1356 = vmatprep.subr.bf16.mxu0 %v1355_v16  ;;  %v1399_v37 = vpack.c.bf16 %v496_v35, %v495_v34  ;;  %v286_v38 = vld [vmem:[#allocation5 + $0x60] sm:$0xff]  ;;  %v287_v39 = vld [vmem:[#allocation5 + $0x68] sm:$0xff]  ;;  %v288_v44 = vld [vmem:[#allocation5 + $0x70] sm:$0xff]  ;;  %1552 = vtanh.f32 %v2016_v29  ;;  %p1725_p6 = pneg %p1724_p2  ;;  %p1730_p10 = scmp.lt.s32.totalorder %s1728_s1, %s1722_s4 }
  0x68   : > { %1388 = vmatprep.subr.bf16.mxu1 %v1387_v17  ;;  %1291 = vmatprep.mubr.f32.mxu1 %v2016_v29  ;;  %v497_v40 = vld [vmem:[#allocation5 + $0xe0] sm:$0xff]  ;;  %v498_v41 = vld [vmem:[#allocation5 + $0xe8] sm:$0xff]  ;;  %v1371_v42 = vpack.c.bf16 %v287_v39, %v286_v38  ;;  %v289_v45 = vld [vmem:[#allocation5 + $0x78] sm:$0xff] }
  0x69   : > { %v1403_v43 = vpack.c.bf16 %v498_v41, %v497_v40  ;;  %v499_v46 = vld [vmem:[#allocation5 + $0xf0] sm:$0xff]  ;;  %v500_v47 = vld [vmem:[#allocation5 + $0xf8] sm:$0xff]  ;;  %v1375_v48 = vpack.c.bf16 %v289_v45, %v288_v44  ;;  %v696_v50 = vld [vmem:[#allocation5 + $0x100] sm:$0xff]  ;;  %p1731_p12 = por %p1730_p10, %p1729_p7 }
  0x6a   : > { %1358 = vmatpush3.bf16.msra.mxu0 %v1355_v16  ;;  %v1407_v49 = vpack.c.bf16 %v500_v47, %v499_v46  ;;  %v697_v51 = vld [vmem:[#allocation5 + $0x108] sm:$0xff]  ;;  %v698_v53 = vld [vmem:[#allocation5 + $0x110] sm:$0xff]  ;;  %v699_v54 = vld [vmem:[#allocation5 + $0x118] sm:$0xff] }
  0x6b   : > { %1390 = vmatpush3.bf16.msra.mxu1 %v1387_v17  ;;  %1360 = vmatprep.subr.bf16.mxu0 %v1359_v22  ;;  %v1411_v52 = vpack.c.bf16 %v697_v51, %v696_v50  ;;  %v2020_v55 = vld [vmem:[%s2001_s24 + $0x8] sm:$0xff]  ;;  %v1415_v57 = vpack.c.bf16 %v699_v54, %v698_v53  ;;  %v700_v58 = vld [vmem:[#allocation5 + $0x120] sm:$0xff]  ;;  %v2027_v60 = vld [vmem:[%s2001_s24 + $0x10] sm:$0xff]  ;;  %p1732_p13 = pnand %p1731_p12, %p1725_p6 }
  0x6c   : > { %1392 = vmatprep.subr.bf16.mxu1 %v1391_v23  ;;  %v2023_v56 = vld [vmem:[%s2001_s24 + $0x48] sm:$0xff]  ;;  %v2031_v61 = vld [vmem:[%s2001_s24 + $0x50] sm:$0xff]  ;;  %v2034_v62 = vld [vmem:[%s2001_s24 + $0x18] sm:$0xff]  ;;  %1554 = vtanh.f32 %v2020_v55 }
  0x6d   : > { %v701_v59 = vld [vmem:[#allocation5 + $0x128] sm:$0xff]  ;;  %v2037_v0 = vld [vmem:[%s2001_s24 + $0x58] sm:$0xff]  ;;  %v702_v1 = vld [vmem:[#allocation5 + $0x130] sm:$0xff]  ;;  %1556 = vtanh.f32 %v2023_v56 }
  0x6e   : > { %1362 = vmatpush3.bf16.msra.mxu0 %v1359_v22  ;;  %v1419_v63 = vpack.c.bf16 %v701_v59, %v700_v58  ;;  %v703_v2 = vld [vmem:[#allocation5 + $0x138] sm:$0xff]  ;;  %v2043_v3 = vld [vmem:[%s2001_s24 + $0x20] sm:$0xff]  ;;  %v2050_v5 = vld [vmem:[%s2001_s24 + $0x28] sm:$0xff]  ;;  %1558 = vtanh.f32 %v2027_v60 }
  0x6f   : > { %1394 = vmatpush3.bf16.msra.mxu1 %v1391_v23  ;;  %1364 = vmatprep.subr.bf16.mxu0 %v1363_v30  ;;  %v2047_v4 = vld [vmem:[%s2001_s24 + $0x60] sm:$0xff]  ;;  %v1423_v6 = vpack.c.bf16 %v703_v2, %v702_v1  ;;  %v2053_v7 = vld [vmem:[%s2001_s24 + $0x68] sm:$0xff]  ;;  %v2059_v10 = vld [vmem:[%s2001_s24 + $0x30] sm:$0xff]  ;;  %1560 = vtanh.f32 %v2031_v61  ;;  %v2117_v34 = vpop.eup %1550 }
  0x70   : > { %1396 = vmatprep.subr.bf16.mxu1 %v1395_v31  ;;  %v704_v8 = vld [vmem:[#allocation5 + $0x140] sm:$0xff]  ;;  %v705_v9 = vld [vmem:[#allocation5 + $0x148] sm:$0xff]  ;;  %v2063_v11 = vld [vmem:[%s2001_s24 + $0x70] sm:$0xff]  ;;  %1562 = vtanh.f32 %v2034_v62 }
  0x71   : > { %v2066_v12 = vld [vmem:[%s2001_s24 + $0x38] sm:$0xff]  ;;  %v1427_v13 = vpack.c.bf16 %v705_v9, %v704_v8  ;;  %v706_v15 = vld [vmem:[#allocation5 + $0x150] sm:$0xff]  ;;  %v2075_v17 = vld [vmem:[%s2001_s24 + $0x80] sm:$0xff]  ;;  %1564 = vtanh.f32 %v2037_v0  ;;  %v2120_v26 = vpop.eup %1552 }
  0x72   : > { %1366 = vmatpush3.bf16.msra.mxu0 %v1363_v30  ;;  %v2069_v14 = vld [vmem:[%s2001_s24 + $0x78] sm:$0xff]  ;;  %v2079_v18 = vld [vmem:[%s2001_s24 + $0xa0] sm:$0xff]  ;;  %v709_v21 = vld [vmem:[#allocation5 + $0x168] sm:$0xff]  ;;  %1566 = vtanh.f32 %v2043_v3 }
  0x73   : > { %1398 = vmatpush3.bf16.msra.mxu1 %v1395_v31  ;;  %1368 = vmatprep.subr.bf16.mxu0 %v1367_v36  ;;  %v707_v16 = vld [vmem:[#allocation5 + $0x158] sm:$0xff]  ;;  %v708_v20 = vld [vmem:[#allocation5 + $0x160] sm:$0xff]  ;;  %v710_v23 = vld [vmem:[#allocation5 + $0x170] sm:$0xff]  ;;  %1568 = vtanh.f32 %v2047_v4 }
  0x74   : > { %1400 = vmatprep.subr.bf16.mxu1 %v1399_v37  ;;  %v1431_v19 = vpack.c.bf16 %v707_v16, %v706_v15  ;;  %v1435_v22 = vpack.c.bf16 %v709_v21, %v708_v20  ;;  %v711_v24 = vld [vmem:[#allocation5 + $0x178] sm:$0xff]  ;;  %v2084_v27 = vld [vmem:[%s2001_s24 + $0x88] sm:$0xff]  ;;  %v2090_v30 = vld [vmem:[%s2001_s24 + $0x90] sm:$0xff]  ;;  %1570 = vtanh.f32 %v2050_v5 }
  0x75   : > { %v1439_v25 = vpack.c.bf16 %v711_v24, %v710_v23  ;;  %v2087_v28 = vld [vmem:[%s2001_s24 + $0xa8] sm:$0xff]  ;;  %v2093_v31 = vld [vmem:[%s2001_s24 + $0xb0] sm:$0xff]  ;;  %v2099_v32 = vld [vmem:[%s2001_s24 + $0x98] sm:$0xff]  ;;  %1572 = vtanh.f32 %v2053_v7 }
  0x76   : > { %1370 = vmatpush3.bf16.msra.mxu0 %v1367_v36  ;;  %v2103_v33 = vld [vmem:[%s2001_s24 + $0xb8] sm:$0xff]  ;;  %v2123_v29 = vpop.eup %1554  ;;  %1574 = vtanh.f32 %v2059_v10 }
  0x77   : > { %1402 = vmatpush3.bf16.msra.mxu1 %v1399_v37  ;;  %1372 = vmatprep.subr.bf16.mxu0 %v1371_v42  ;;  %v2126_v35 = vpop.eup %1556  ;;  %1576 = vtanh.f32 %v2063_v11 }
  0x78   : > { %1404 = vmatprep.subr.bf16.mxu1 %v1403_v43  ;;  %v2129_v36 = vpop.eup %1558  ;;  %1578 = vtanh.f32 %v2066_v12 }
  0x79   : > { %v2132_v37 = vpop.eup %1560  ;;  %1580 = vtanh.f32 %v2069_v14 }
  0x7a   : > { %1374 = vmatpush3.bf16.msra.mxu0 %v1371_v42  ;;  %v2135_v39 = vpop.eup %1562  ;;  %1582 = vtanh.f32 %v2075_v17 }
  0x7b   : > { %1406 = vmatpush3.bf16.msra.mxu1 %v1403_v43  ;;  %1376 = vmatprep.subr.bf16.mxu0 %v1375_v48  ;;  %v2138_v43 = vpop.eup %1564  ;;  %1584 = vtanh.f32 %v2079_v18 }
  0x7c   : > { %1408 = vmatprep.subr.bf16.mxu1 %v1407_v49  ;;  %v2141_v47 = vpop.eup %1566 }
  0x7e   : > { %1378 = vmatpush3.bf16.msra.mxu0 %v1375_v48 }
  0x7f   : > { %1410 = vmatpush3.bf16.msra.mxu1 %v1407_v49  ;;  %1412 = vmatprep.subr.bf16.mxu0 %v1411_v52  ;;  %v2143_v49 = vpop.eup %1568 }
  0x80   : > { %1443 = vmatprep.subr.bf16.mxu1 %v1411_v52  ;;  %v2145_v51 = vpop.eup %1570 }
  0x81   : > { %1248 = vmatmul.mubr.f32.vlgmr.msra.gmra.mrb[0].mxu0 %v2020_v55  ;;  %v2147_v55 = vpop.eup %1572 }
  0x82   : > { %1292 = vmatmul.mubr.f32.vlgmr.msra.gmra.mrb[0].mxu1 %v2023_v56  ;;  %1414 = vmatpush3.bf16.msra.mxu0 %v1411_v52  ;;  %v2149_v59 = vpop.eup %1574 }
  0x83   : > { %1451 = vmatpush3.bf16.msra.mxu1 %v1411_v52  ;;  %1416 = vmatprep.subr.bf16.mxu0 %v1415_v57 }
  0x84   : > { %1444 = vmatprep.subr.bf16.mxu1 %v1415_v57  ;;  %1250 = vmatprep.mubr.f32.mxu0 %v2027_v60 }
  0x85   : > { %1294 = vmatprep.mubr.f32.mxu1 %v2031_v61  ;;  %1251 = vmatmul.mubr.f32.gmra.mrb[2].mxu0 %v2034_v62  ;;  %v2151_v61 = vpop.eup %1576 }
  0x86   : > { %1418 = vmatpush3.bf16.msra.mxu0 %v1415_v57  ;;  %1295 = vmatmul.mubr.f32.gmra.mrb[2].mxu1 %v2037_v0 }
  0x87   : > { %1452 = vmatpush3.bf16.msra.mxu1 %v1415_v57  ;;  %1420 = vmatprep.subr.bf16.mxu0 %v1419_v63 }
  0x88   : > { %1445 = vmatprep.subr.bf16.mxu1 %v1419_v63  ;;  %1253 = vmatprep.mubr.f32.mxu0 %v2043_v3 }
  0x89   : > { %1297 = vmatprep.mubr.f32.mxu1 %v2047_v4  ;;  %1254 = vmatmul.mubr.f32.gmra.mrb[4].mxu0 %v2050_v5 }
  0x8a   : > { %1422 = vmatpush3.bf16.msra.mxu0 %v1419_v63  ;;  %1298 = vmatmul.mubr.f32.gmra.mrb[4].mxu1 %v2053_v7 }
  0x8b   : > { %1453 = vmatpush3.bf16.msra.mxu1 %v1419_v63  ;;  %1424 = vmatprep.subr.bf16.mxu0 %v1423_v6  ;;  %v2153_v63 = vpop.eup %1578 }
  0x8c   : > { %1446 = vmatprep.subr.bf16.mxu1 %v1423_v6  ;;  %1256 = vmatprep.mubr.f32.mxu0 %v2059_v10  ;;  %v2155_v3 = vpop.eup %1580 }
  0x8d   : > { %1300 = vmatprep.mubr.f32.mxu1 %v2063_v11  ;;  %1257 = vmatmul.mubr.f32.gmra.mrb[6].mxu0 %v2066_v12  ;;  %v2157_v7 = vpop.eup %1582 }
  0x8e   : > { %1426 = vmatpush3.bf16.msra.mxu0 %v1423_v6  ;;  %1301 = vmatmul.mubr.f32.gmra.mrb[6].mxu1 %v2069_v14  ;;  %v2159_v9 = vpop.eup %1584 }
  0x8f   : > { %1454 = vmatpush3.bf16.msra.mxu1 %v1423_v6  ;;  %1428 = vmatprep.subr.bf16.mxu0 %v1427_v13 }
  0x90   : > { %1447 = vmatprep.subr.bf16.mxu1 %v1427_v13  ;;  %1335 = vmatprep.mubr.f32.mxu0 %v2075_v17 }
  0x91   : > { %1341 = vmatprep.mubr.f32.mxu1 %v2079_v18 }
  0x92   : > { %1430 = vmatpush3.bf16.msra.mxu0 %v1427_v13 }
  0x93   : > { %1455 = vmatpush3.bf16.msra.mxu1 %v1427_v13  ;;  %1432 = vmatprep.subr.bf16.mxu0 %v1431_v19 }
  0x94   : > { %1448 = vmatprep.subr.bf16.mxu1 %v1431_v19 }
  0x96   : > { %1434 = vmatpush3.bf16.msra.mxu0 %v1431_v19 }
  0x97   : > { %1456 = vmatpush3.bf16.msra.mxu1 %v1431_v19  ;;  %1436 = vmatprep.subr.bf16.mxu0 %v1435_v22 }
  0x98   : > { %1449 = vmatprep.subr.bf16.mxu1 %v1435_v22 }
  0x9a   : > { %1438 = vmatpush3.bf16.msra.mxu0 %v1435_v22 }
  0x9b   : > { %1457 = vmatpush3.bf16.msra.mxu1 %v1435_v22  ;;  %1440 = vmatprep.subr.bf16.mxu0 %v1439_v25 }
  0x9c   : > { %1450 = vmatprep.subr.bf16.mxu1 %v1439_v25 }
  0x9e   : > { %1442 = vmatpush3.bf16.msra.mxu0 %v1439_v25 }
  0x9f   : > { %1458 = vmatpush3.bf16.msra.mxu1 %v1439_v25 }
  0xa1   : > { %1336 = vmatmul.mubr.f32.vlgmr.msra.gmra.mrb[8].mxu0 %v2084_v27 }
  0xa2   : > { %1342 = vmatmul.mubr.f32.vlgmr.msra.gmra.mrb[8].mxu1 %v2087_v28  ;;  %1338 = vmatprep.mubr.f32.mxu0 %v2090_v30 }
  0xa3   : > { %1344 = vmatprep.mubr.f32.mxu1 %v2093_v31 }
  0xa5   : > { %1339 = vmatmul.mubr.f32.gmra.mrb[10].mxu0 %v2099_v32 }
  0xa6   : > { %1345 = vmatmul.mubr.f32.gmra.mrb[10].mxu1 %v2103_v33 }
 0x154   : > { %v1249_v38 = vpop.f32.mrb[0].mxu0 }
 0x155   : > { %v1093_v40 = vmul.f32 -1.442695, %v1249_v38  ;;  %v1293_v41 = vpop.f32.mrb[0].mxu1  ;;  %v356_v42 = vpop.f32.mrb[1].mxu0 }
 0x156   : > { %v1109_v44 = vmul.f32 -1.442695, %v1293_v41  ;;  %v1092_v45 = vmul.f32 -1.442695, %v356_v42  ;;  %v567_v46 = vpop.f32.mrb[1].mxu1 }
 0x157   : > { %1586 = vpow2.f32 %v1093_v40  ;;  %v1108_v48 = vmul.f32 -1.442695, %v567_v46 }
 0x158   : > { %1588 = vpow2.f32 %v1109_v44  ;;  %v1252_v50 = vpop.f32.mrb[2].mxu0 }
 0x159   : > { %1590 = vpow2.f32 %v1092_v45  ;;  %v1095_v52 = vmul.f32 -1.442695, %v1252_v50  ;;  %v1296_v53 = vpop.f32.mrb[2].mxu1  ;;  %v366_v54 = vpop.f32.mrb[3].mxu0 }
 0x15a   : > { %1592 = vpow2.f32 %v1108_v48  ;;  %v1111_v56 = vmul.f32 -1.442695, %v1296_v53  ;;  %v1094_v57 = vmul.f32 -1.442695, %v366_v54  ;;  %v577_v58 = vpop.f32.mrb[3].mxu1 }
 0x15b   : > { %1594 = vpow2.f32 %v1095_v52  ;;  %v1110_v60 = vmul.f32 -1.442695, %v577_v58 }
 0x15c   : > { %1596 = vpow2.f32 %v1111_v56  ;;  %v1255_v62 = vpop.f32.mrb[4].mxu0 }
 0x15d   : > { %1598 = vpow2.f32 %v1094_v57  ;;  %v1097_v0 = vmul.f32 -1.442695, %v1255_v62  ;;  %v1299_v1 = vpop.f32.mrb[4].mxu1  ;;  %v376_v2 = vpop.f32.mrb[5].mxu0 }
 0x15e   : > { %1600 = vpow2.f32 %v1110_v60  ;;  %v1113_v4 = vmul.f32 -1.442695, %v1299_v1  ;;  %v1096_v5 = vmul.f32 -1.442695, %v376_v2  ;;  %v587_v6 = vpop.f32.mrb[5].mxu1 }
 0x15f   : > { %1602 = vpow2.f32 %v1097_v0  ;;  %v1112_v8 = vmul.f32 -1.442695, %v587_v6 }
 0x160   : > { %1604 = vpow2.f32 %v1113_v4  ;;  %v1258_v10 = vpop.f32.mrb[6].mxu0 }
 0x161   : > { %v1587_v11 = vpop.eup %1586  ;;  %1606 = vpow2.f32 %v1096_v5  ;;  %v1099_v12 = vmul.f32 -1.442695, %v1258_v10  ;;  %v1302_v13 = vpop.f32.mrb[6].mxu1 }
 0x162   : > { %v386_v14 = vpop.f32.mrb[7].mxu0  ;;  %v1589_v15 = vpop.eup %1588  ;;  %v420_v16 = vadd.f32 1.0, %v1587_v11  ;;  %1608 = vpow2.f32 %v1112_v8  ;;  %v1115_v58 = vmul.f32 -1.442695, %v1302_v13 }
 0x163   : > { %v597_v17 = vpop.f32.mrb[7].mxu1  ;;  %v1591_v18 = vpop.eup %1590  ;;  %v631_v19 = vadd.f32 1.0, %v1589_v15  ;;  %1610 = vpow2.f32 %v1099_v12  ;;  %v1098_v0 = vmul.f32 -1.442695, %v386_v14 }
 0x164   : > { %v1593_v20 = vpop.eup %1592  ;;  %1612 = vrcp.f32 %v420_v16  ;;  %v419_v21 = vadd.f32 1.0, %v1591_v18  ;;  %v1114_v4 = vmul.f32 -1.442695, %v597_v17 }
 0x165   : > { %v1595_v22 = vpop.eup %1594  ;;  %1614 = vrcp.f32 %v631_v19  ;;  %v630_v23 = vadd.f32 1.0, %v1593_v20 }
 0x166   : > { %v1597_v24 = vpop.eup %1596  ;;  %1616 = vrcp.f32 %v419_v21  ;;  %v422_v25 = vadd.f32 1.0, %v1595_v22 }
 0x167   : > { %v1599_v38 = vpop.eup %1598  ;;  %1618 = vrcp.f32 %v630_v23  ;;  %v633_v40 = vadd.f32 1.0, %v1597_v24 }
 0x168   : > { %v1601_v41 = vpop.eup %1600  ;;  %1620 = vrcp.f32 %v422_v25  ;;  %v421_v42 = vadd.f32 1.0, %v1599_v38 }
 0x169   : > { %v1603_v44 = vpop.eup %1602  ;;  %1622 = vrcp.f32 %v633_v40  ;;  %v632_v45 = vadd.f32 1.0, %v1601_v41 }
 0x16a   : > { %v1605_v46 = vpop.eup %1604  ;;  %1624 = vrcp.f32 %v421_v42  ;;  %v424_v48 = vadd.f32 1.0, %v1603_v44 }
 0x16b   : > { %v1607_v50 = vpop.eup %1606  ;;  %1626 = vrcp.f32 %v632_v45  ;;  %v635_v52 = vadd.f32 1.0, %v1605_v46 }
 0x16c   : > { %v1609_v53 = vpop.eup %1608  ;;  %1628 = vrcp.f32 %v424_v48  ;;  %v423_v54 = vadd.f32 1.0, %v1607_v50 }
 0x16d   : > { %v1611_v56 = vpop.eup %1610  ;;  %1630 = vrcp.f32 %v635_v52  ;;  %v634_v57 = vadd.f32 1.0, %v1609_v53 }
 0x16e   : > { %v1613_v60 = vpop.eup %1612  ;;  %1632 = vrcp.f32 %v423_v54  ;;  %v426_v62 = vadd.f32 1.0, %v1611_v56 }
 0x16f   : > { %v1615_v1 = vpop.eup %1614  ;;  %v452_v2 = vmul.f32 %v1613_v60, %v2123_v29  ;;  %1634 = vrcp.f32 %v634_v57 }
 0x170   : > { %v1617_v5 = vpop.eup %1616  ;;  %v663_v6 = vmul.f32 %v1615_v1, %v2126_v35  ;;  %v2163_v8 = vadd.f32 %v1615_v1, %v1613_v60  ;;  %1636 = vrcp.f32 %v426_v62 }
 0x171   : > { %v1619_v10 = vpop.eup %1618  ;;  %v451_v11 = vmul.f32 %v1617_v5, %v2117_v34  ;;  %1638 = vpow2.f32 %v1115_v58 }
 0x172   : > { %v1621_v12 = vpop.eup %1620  ;;  %v2166_v13 = vadd.f32 %v663_v6, %v452_v2  ;;  %v662_v14 = vmul.f32 %v1619_v10, %v2120_v26  ;;  %v2169_v15 = vadd.f32 %v1619_v10, %v1617_v5  ;;  %1640 = vpow2.f32 %v1098_v0 }
 0x173   : > { %v1623_v29 = vpop.eup %1622  ;;  %v454_v16 = vmul.f32 %v1621_v12, %v2135_v39  ;;  %1642 = vpow2.f32 %v1114_v4 }
 0x174   : > { %v1625_v35 = vpop.eup %1624  ;;  %1644 = vtanh.f32 %v2084_v27  ;;  %v2173_v17 = vadd.f32 %v662_v14, %v451_v11  ;;  %v665_v34 = vmul.f32 %v1623_v29, %v2138_v43  ;;  %v2176_v18 = vadd.f32 %v1623_v29, %v1621_v12  ;;  %v1337_v19 = vpop.f32.mrb[8].mxu0 }
 0x175   : > { %v1627_v20 = vpop.eup %1626  ;;  %1646 = vtanh.f32 %v2087_v28  ;;  %v453_v26 = vmul.f32 %v1625_v35, %v2129_v36  ;;  %v1125_v21 = vmul.f32 -1.442695, %v1337_v19  ;;  %v1343_v22 = vpop.f32.mrb[8].mxu1 }
 0x176   : > { %v778_v23 = vpop.f32.mrb[9].mxu0  ;;  %v1629_v39 = vpop.eup %1628  ;;  %v2180_v24 = vadd.f32 %v665_v34, %v454_v16  ;;  %v664_v27 = vmul.f32 %v1627_v20, %v2132_v37  ;;  %v2183_v25 = vadd.f32 %v1627_v20, %v1625_v35  ;;  %v1129_v38 = vmul.f32 -1.442695, %v1343_v22 }
 0x177   : > { %v798_v43 = vpop.f32.mrb[9].mxu1  ;;  %v1631_v40 = vpop.eup %1630  ;;  %v456_v41 = vmul.f32 %v1629_v39, %v2145_v51  ;;  %1648 = vpow2.f32 %v1125_v21  ;;  %v1124_v42 = vmul.f32 -1.442695, %v778_v23 }
 0x178   : > { %v1128_v28 = vmul.f32 -1.442695, %v798_v43  ;;  %v1633_v44 = vpop.eup %1632  ;;  %v2186_v36 = vadd.f32 %v664_v27, %v453_v26  ;;  %v667_v45 = vmul.f32 %v1631_v40, %v2147_v55  ;;  %v2189_v46 = vadd.f32 %v1631_v40, %v1629_v39  ;;  %v1340_v48 = vpop.f32.mrb[10].mxu0 }
 0x179   : > { %1650 = vpow2.f32 %v1129_v38  ;;  %v1635_v37 = vpop.eup %1634  ;;  %v455_v50 = vmul.f32 %v1633_v44, %v2141_v47  ;;  %v1127_v52 = vmul.f32 -1.442695, %v1340_v48  ;;  %v1346_v53 = vpop.f32.mrb[10].mxu1 }
 0x17a   : > { %1652 = vpow2.f32 %v1124_v42  ;;  %v788_v54 = vpop.f32.mrb[11].mxu0  ;;  %v1637_v51 = vpop.eup %1636  ;;  %v2192_v56 = vadd.f32 %v667_v45, %v456_v41  ;;  %v666_v57 = vmul.f32 %v1635_v37, %v2143_v49  ;;  %v2195_v58 = vadd.f32 %v1635_v37, %v1633_v44 }
 0x17b   : > { %1654 = vpow2.f32 %v1128_v28  ;;  %v808_v55 = vpop.f32.mrb[11].mxu1  ;;  %v1639_v60 = vpop.eup %1638  ;;  %v458_v62 = vmul.f32 %v1637_v51, %v2153_v63  ;;  %v1131_v0 = vmul.f32 -1.442695, %v1346_v53  ;;  %v1126_v6 = vmul.f32 -1.442695, %v788_v54 }
 0x17c   : > { %1656 = vpow2.f32 %v1127_v52  ;;  %v1641_v1 = vpop.eup %1640  ;;  %v2199_v47 = vadd.f32 %v666_v57, %v455_v50  ;;  %v637_v2 = vadd.f32 1.0, %v1639_v60  ;;  %v1130_v11 = vmul.f32 -1.442695, %v808_v55 }
 0x17d   : > { %1658 = vtanh.f32 %v2099_v32  ;;  %v1643_v4 = vpop.eup %1642  ;;  %v425_v5 = vadd.f32 1.0, %v1641_v1 }
 0x17e   : > { %1660 = vpow2.f32 %v1131_v0  ;;  %v1645_v49 = vpop.eup %1644  ;;  %v636_v10 = vadd.f32 1.0, %v1643_v4 }
 0x17f   : > { %1662 = vrcp.f32 %v637_v2  ;;  %v1647_v12 = vpop.eup %1646 }
 0x180   : > { %1664 = vrcp.f32 %v425_v5 }
 0x181   : > { %1666 = vrcp.f32 %v636_v10  ;;  %v1649_v63 = vpop.eup %1648 }
 0x182   : > { %1668 = vpow2.f32 %v1126_v6  ;;  %v842_v29 = vadd.f32 1.0, %v1649_v63 }
 0x183   : > { %v1651_v14 = vpop.eup %1650  ;;  %1670 = vpow2.f32 %v1130_v11 }
 0x184   : > { %v1653_v32 = vpop.eup %1652  ;;  %1672 = vtanh.f32 %v2103_v33  ;;  %v846_v16 = vadd.f32 1.0, %v1651_v14 }
 0x185   : > { %v1655_v35 = vpop.eup %1654  ;;  %1674 = vrcp.f32 %v842_v29  ;;  %v841_v34 = vadd.f32 1.0, %v1653_v32 }
 0x186   : > { %v1657_v19 = vpop.eup %1656  ;;  %1676 = vrcp.f32 %v846_v16  ;;  %v845_v20 = vadd.f32 1.0, %v1655_v35 }
 0x187   : > { %v1659_v26 = vpop.eup %1658  ;;  %1678 = vrcp.f32 %v841_v34  ;;  %v844_v21 = vadd.f32 1.0, %v1657_v19 }
 0x188   : > { %v1661_v22 = vpop.eup %1660  ;;  %1680 = vrcp.f32 %v845_v20 }
 0x189   : > { %v1663_v23 = vpop.eup %1662  ;;  %1682 = vrcp.f32 %v844_v21  ;;  %v848_v39 = vadd.f32 1.0, %v1661_v22 }
 0x18a   : > { %v1665_v27 = vpop.eup %1664  ;;  %v669_v38 = vmul.f32 %v1663_v23, %v2155_v3  ;;  %v685_v33 = vadd.f32 %v1663_v23, %v1637_v51 }
 0x18b   : > { %v1667_v43 = vpop.eup %1666  ;;  %v457_v40 = vmul.f32 %v1665_v27, %v2149_v59  ;;  %1684 = vrcp.f32 %v848_v39 }
 0x18c   : > { %v1669_v41 = vpop.eup %1668  ;;  %v677_v42 = vadd.f32 %v669_v38, %v458_v62  ;;  %v668_v28 = vmul.f32 %v1667_v43, %v2151_v61  ;;  %v684_v44 = vadd.f32 %v1667_v43, %v1665_v27  ;;  %1686 = vtanh.f32 %v2090_v30 }
 0x18d   : > { %v1671_v45 = vpop.eup %1670  ;;  %v843_v48 = vadd.f32 1.0, %v1669_v41  ;;  %1688 = vtanh.f32 %v2093_v31 }
 0x18e   : > { %v1673_v37 = vpop.eup %1672  ;;  %v676_v50 = vadd.f32 %v668_v28, %v457_v40  ;;  %v847_v3 = vadd.f32 1.0, %v1671_v45 }
 0x18f   : > { %v1675_v52 = vpop.eup %1674  ;;  %1690 = vrcp.f32 %v843_v48 }
 0x190   : > { %v1677_v53 = vpop.eup %1676  ;;  %v874_v59 = vmul.f32 %v1675_v52, %v1645_v49  ;;  %v890_v54 = vadd.f32 %v1675_v52, %v2163_v8  ;;  %1692 = vrcp.f32 %v847_v3 }
 0x191   : > { %v1679_v51 = vpop.eup %1678  ;;  %v878_v61 = vmul.f32 %v1677_v53, %v1647_v12  ;;  %v894_v57 = vadd.f32 %v1677_v53, %v2189_v46 }
 0x192   : > { %v1681_v55 = vpop.eup %1680  ;;  %v882_v30 = vadd.f32 %v874_v59, %v2166_v13  ;;  %906 = vst [vmem:[%s2211_s23 + $0x8] sm:$0xff] %v890_v54  ;;  %v873_v31 = vmul.f32 %v1679_v51, %v2157_v7  ;;  %v889_v60 = vadd.f32 %v1679_v51, %v2169_v15 }
 0x193   : > { %v1683_v8 = vpop.eup %1682  ;;  %v886_v62 = vadd.f32 %v878_v61, %v2192_v56  ;;  %910 = vst [vmem:[%s2211_s23 + $0x28] sm:$0xff] %v894_v57  ;;  %v877_v46 = vmul.f32 %v1681_v55, %v2159_v9  ;;  %v893_v13 = vadd.f32 %v1681_v55, %v2195_v58 }
 0x194   : > { %898 = vst [vmem:[%s2220_s25 + $0x8] sm:$0xff] %v882_v30  ;;  %v881_v7 = vadd.f32 %v873_v31, %v2173_v17  ;;  %905 = vst [vmem:[%s2211_s23] sm:$0xff] %v889_v60  ;;  %v876_v15 = vmul.f32 %v1683_v8, %v1659_v26  ;;  %v892_v56 = vadd.f32 %v1683_v8, %v2176_v18 }
 0x195   : > { %v1685_v0 = vpop.eup %1684  ;;  %902 = vst [vmem:[%s2220_s25 + $0x28] sm:$0xff] %v886_v62  ;;  %v885_v9 = vadd.f32 %v877_v46, %v2199_v47  ;;  %909 = vst [vmem:[%s2211_s23 + $0x20] sm:$0xff] %v893_v13 }
 0x196   : > { %897 = vst [vmem:[%s2220_s25] sm:$0xff] %v881_v7  ;;  %v884_v58 = vadd.f32 %v876_v15, %v2180_v24  ;;  %908 = vst [vmem:[%s2211_s23 + $0x18] sm:$0xff] %v892_v56  ;;  %v880_v17 = vmul.f32 %v1685_v0, %v1673_v37  ;;  %v896_v1 = vadd.f32 %v1685_v0, %v685_v33  ;;  %v1687_v2 = vpop.eup %1686 }
 0x197   : > { %901 = vst [vmem:[%s2220_s25 + $0x20] sm:$0xff] %v885_v9  ;;  %v1689_v4 = vpop.eup %1688 }
 0x198   : > { %900 = vst [vmem:[%s2220_s25 + $0x18] sm:$0xff] %v884_v58  ;;  %v888_v18 = vadd.f32 %v880_v17, %v677_v42  ;;  %912 = vst [vmem:[%s2211_s23 + $0x38] sm:$0xff] %v896_v1 }
 0x199   : > { %v1691_v47 = vpop.eup %1690 }
 0x19a   : > { %v1693_v5 = vpop.eup %1692  ;;  %904 = vst [vmem:[%s2220_s25 + $0x38] sm:$0xff] %v888_v18  ;;  %v875_v24 = vmul.f32 %v1691_v47, %v1687_v2  ;;  %v891_v6 = vadd.f32 %v1691_v47, %v2183_v25 }
 0x19b   : > { %v879_v49 = vmul.f32 %v1693_v5, %v1689_v4  ;;  %v895_v10 = vadd.f32 %v1693_v5, %v684_v44 }
 0x19c   : > { %v883_v11 = vadd.f32 %v875_v24, %v2186_v36  ;;  %907 = vst [vmem:[%s2211_s23 + $0x10] sm:$0xff] %v891_v6 }
 0x19d   : > { %v887_v12 = vadd.f32 %v879_v49, %v676_v50  ;;  %911 = vst [vmem:[%s2211_s23 + $0x30] sm:$0xff] %v895_v10 }
 0x19e   : > { %899 = vst [vmem:[%s2220_s25 + $0x10] sm:$0xff] %v883_v11 }
 0x19f   : > { %1735 = shalt.err (!%p1732_p13)
}
 0x1a0   : > { %s1736_s24 = scalar_lea.hbm %s2243_s30, 1024  ;;  %s1740_s29 = scalar_lea.hbm %s2338_s3, 4096 }
 0x1a1   : > { %p1737_p1 = scmp.ne.s32.totalorder %s2243_s30, %s1736_s24  ;;  %p1741_p5 = scmp.lt.u32.totalorder %s2243_s30, %s2338_s3 }
 0x1a2   : > { %p1742_p8 = scmp.lt.u32.totalorder %s1740_s29, %s1736_s24  ;;  %p1744_p11 = scmp.lt.u32.totalorder %s1736_s24, %s2243_s30 }
 0x1a3   : > { %p1738_p3 = pnand %p1737_p1, %p2358_p0 }
 0x1a4   : > { %p1743_p9 = por %p1742_p8, %p1741_p5 }
 0x1a5   : > { %p1739_p4 = pneg %p1738_p3 }
 0x1a6   : > { %p1745_p2 = por %p1744_p11, %p1743_p9 }
 0x1a8   : > { %p1746_p6 = pnand %p1745_p2, %p1739_p4 }
 0x1aa   : > { %1749 = shalt.err (!%p1746_p6)
}
 0x1ab   : > { %s1851_s15 = smov 128   ;;  %s1852_s6 = smov 8   ;;  %903 = vst [vmem:[%s2220_s25 + $0x30] sm:$0xff] %v887_v12 }
 0x1ac   : > { %1475 = dma.vmem_to_hbm [thread:$0]  (%p2358_p0), %s2245_s7, 1024, %s2243_s30, %s919_s5, %s1851_s15, %s1851_s15, %s1852_s6  }
 0x1ad   : > { %s914_s4 = scalar_lea.sflag [#allocation4], %s1997_s9  ;;  %s1750_s11 = scalar_lea.vmem %s2255_s10, 1024 }
 0x1ae   : > { %p1751_p7 = scmp.ne.s32.totalorder %s2255_s10, %s1750_s11  ;;  %s1853_s19 = smov [#allocation7]  }
 0x1af   : > { %s1754_s1 = sshll.u32 %s1853_s19, 4  ;;  %s1755_s1 = int_to_ptr.vmem [resolvable:$false] %s1754_s1 }
 0x1b0   : > { %p1752_p10 = pnand %p1751_p7, %p2358_p0  ;;  %s1756_s24 = scalar_lea.vmem %s1755_s1, 2048 }
 0x1b1   : > { %p1757_p13 = scmp.lt.s32.totalorder %s2255_s10, %s1755_s1  ;;  %p1758_p1 = scmp.lt.s32.totalorder %s1756_s24, %s1750_s11 }
 0x1b2   : > { %p1753_p12 = pneg %p1752_p10 }
 0x1b3   : > { %p1759_p3 = por %p1758_p1, %p1757_p13 }
 0x1b5   : > { %p1760_p4 = pnand %p1759_p3, %p1753_p12 }
 0x1b7   : > { %1763 = shalt.err (!%p1760_p4)
}
 0x1b8   : > { %s1764_s25 = scalar_lea.hbm %s2253_s8, 1024  ;;  %s1768_s5 = scalar_lea.hbm %s2337_s2, 4096 }
 0x1b9   : > { %p1765_p5 = scmp.ne.s32.totalorder %s2253_s8, %s1764_s25  ;;  %p1769_p11 = scmp.lt.u32.totalorder %s2253_s8, %s2337_s2 }
 0x1ba   : > { %p1770_p2 = scmp.lt.u32.totalorder %s1768_s5, %s1764_s25  ;;  %p1772_p7 = scmp.lt.u32.totalorder %s1764_s25, %s2253_s8 }
 0x1bb   : > { %p1766_p8 = pnand %p1765_p5, %p2358_p0 }
 0x1bc   : > { %p1771_p6 = por %p1770_p2, %p1769_p11 }
 0x1bd   : > { %p1767_p9 = pneg %p1766_p8 }
 0x1be   : > { %p1773_p10 = por %p1772_p7, %p1771_p6 }
 0x1c0   : > { %p1774_p12 = pnand %p1773_p10, %p1767_p9 }
 0x1c2   : > { %1777 = shalt.err (!%p1774_p12)
}
 0x1c3   : > { %1474 = dma.vmem_to_hbm [thread:$0]  (%p2358_p0), %s2255_s10, 1024, %s2253_s8, %s914_s4, %s1851_s15, %s1851_s15, %s1852_s6  }
 0x1c4 PF: > { %p1491_p13 = scmp.ge.s32.totalorder %s1840_s17, 2  ;;  %s965_s29 = sand.u32 1, %s1820_s12  }
 0x1c5   : > { %p2359_p1 = scmp.ne.s32.totalorder %s2350_s28, 0  ;;  %s966_s18 = scalar_lea.sflag [#allocation4], %s965_s29 }
 0x1c7   : > { %p1483_p3 = pnand %p1491_p13, %p2359_p1 }
 0x1c9   : > { %1811 = dma.done.wait (!%p1483_p3), %s966_s18, 1024  }
 0x1ca   : > { %1813 = vsyncadd (!%p1483_p3), %s966_s18, 4294966272  ;;  %s975_s26 = scalar_lea.sflag [#allocation9], %s965_s29 }
 0x1cb   : > { %1815 = dma.done.wait (!%p1483_p3), %s975_s26, 1024  }
 0x1cc   : > { %1817 = vsyncadd (!%p1483_p3), %s975_s26, 4294966272  ;;  %s24_s17 = sadd.s32 1, %s1840_s17   ;;  %s2360_s12 = smov %s1824_s13 }
 0x1cd   : > { %p21_p4 = scmp.ge.s32.totalorder %s24_s17, 6   ;;  %s2361_s13 = smov %s1828_s14 }
 0x1ce   : > { %s2362_s14 = smov %s1936_s27  ;;  %s2363_s15 = smov %s1836_s16 }
 0x1cf   : > { %s2364_s16 = smov %s2366_s20  ;;  %23 = sbr.rel (!%p21_p4) target bundleno = 11 (0xb), region = 104 }
 0x1d6   :  { %980 = vsyncpa [#allocation3], 1 }
 0x1d7   :  { %982 = vsyncpa [#allocation3 + $0x1], 1 }
 0x1d8   :  { %983 = vsyncpa [#allocation6], 1 }
 0x1d9   :  { %984 = vsyncpa [#allocation4], 1 }
 0x1da   :  { %986 = vsyncpa [#allocation4 + $0x1], 1 }
 0x1db   :  { %987 = vsyncpa [#allocation9], 1 }
 0x1dc   :  { %989 = vsyncpa [#allocation9 + $0x1], 1 }

</bundles_post_ra>
